<compile_context>
chip_gen: v6e
topology: v6e:2x2x1
jax: 0.10.0
libtpu: 0.0.40
codegen_flags: <defaults>
</compile_context>

<pallas_src>
import math
from functools import partial

import jax
import jax.numpy as jnp
from jax import lax
from jax.experimental import pallas as pl
from jax.experimental.pallas import tpu as pltpu

EPS = 1e-07
_LANE = 128
_MIB = 1024 * 1024


def _tpu_hw():
    """Best-effort (VMEM bytes, TensorCores per device) query.

    Falls back to the most conservative values (v7x-sized 64 MiB VMEM,
    single TensorCore) if the query or attribute names are unavailable.
    """
    vmem_cap = 64 * _MIB
    n_cores = 1
    try:
        info = pltpu.get_tpu_info()
        cap = getattr(info, "vmem_capacity_bytes", None)
        if cap:
            vmem_cap = int(cap)
        for name in ("num_cores", "core_count", "num_tensorcores",
                     "tensorcore_count", "num_tensor_cores"):
            v = getattr(info, name, None)
            if v is None:
                continue
            v = int(v)
            if v > 0:
                n_cores = v
                break
    except Exception:
        pass
    return vmem_cap, n_cores


def _choose_tiling(r, b, x_itemsize, t_itemsize, n_f32_temps,
                   target_block_bytes, vmem_budget, n_cores,
                   forced_tr=None, force_n_par=None):
    """Pick (tr, kb, n_par): rows per block, number of row blocks, slices."""
    native_row = b * _LANE * (x_itemsize + t_itemsize)       # both inputs, 1 buf
    f32_row = b * _LANE * 4
    row_bytes = 2 * native_row + n_f32_temps * f32_row       # 2 bufs + f32 temps
    budget = max(_MIB, vmem_budget - 8 * _MIB)                # out bufs + slack
    tr_cap = max(8, ((budget // row_bytes) // 8) * 8)

    if forced_tr is not None:
        tr = int(forced_tr)
    else:
        itemsize = max(x_itemsize, t_itemsize)
        tr = target_block_bytes // (b * _LANE * itemsize)
        tr = max(tr, 64)        # keep per-batch contiguous DMA runs >= ~32 KiB
        tr = min(tr, tr_cap)

    if tr >= r:
        return r, 1, 1          # one full-extent block (always legal)

    tr = max(8, (tr // 8) * 8)  # (8, 128) tiling constraint

    n_par = 2 if n_cores >= 2 else 1
    if force_n_par is not None:
        n_par = int(force_n_par)

    if forced_tr is None:
        # Prefer a tile in [tr/2, tr] (multiple of 8) that divides R and gives
        # a block count divisible by n_par: the hot loop stays mask-free and
        # no overhang block is ever fetched.
        lo = max(8, ((tr // 2) // 8) * 8)
        fallback = None
        for cand in range(tr, lo - 1, -8):
            if r % cand:
                continue
            kbc = r // cand
            if kbc % n_par == 0:
                return cand, kbc, n_par
            if fallback is None:
                fallback = (cand, kbc)
        if fallback is not None:
            return fallback[0], fallback[1], n_par

    kb = -(-r // tr)
    return tr, kb, n_par


def _dice_partial_kernel(x_ref, t_ref, inter_ref, card_ref, *,
                         tr, kpp, r_total, sublane_acc, mask_needed):
    p = pl.program_id(0)   # parallel slice (one per TensorCore on v7x)
    k = pl.program_id(1)   # reduction step within the slice

    @pl.when(k == 0)
    def _():
        inter_ref[...] = jnp.zeros_like(inter_ref)
        card_ref[...] = jnp.zeros_like(card_ref)

    x = x_ref[...].astype(jnp.float32)   # (B, tr, 128)
    t = t_ref[...].astype(jnp.float32)   # (B, tr, 128)

    def _accumulate(xv, tv):
        prod = xv * tv
        card = xv + tv
        if sublane_acc:
            if tr > 8:
                bsz = xv.shape[0]
                # vreg-aligned reduce: (B, tr, 128) -> (B, tr//8, 8, 128),
                # sum the chunk axis only -> full-vreg VPU adds, no XLU.
                prod = prod.reshape(bsz, tr // 8, 8, _LANE)
                card = card.reshape(bsz, tr // 8, 8, _LANE)
                inter_ref[...] += jnp.sum(prod, axis=1)
                card_ref[...] += jnp.sum(card, axis=1)
            else:                          # tr == 8: block is one slab per batch
                inter_ref[...] += prod
                card_ref[...] += card
        else:
            # Only reachable for a single full-extent block with R % 8 != 0:
            # plain cross-sublane reduce into a (B, 128) accumulator.
            inter_ref[...] += jnp.sum(prod, axis=1)
            card_ref[...] += jnp.sum(card, axis=1)

    if not mask_needed:
        _accumulate(x, t)
    else:
        blk = p * kpp + k
        is_ragged = (blk + 1) * tr > r_total

        @pl.when(jnp.logical_not(is_ragged))
        def _():
            _accumulate(x, t)

        @pl.when(is_ragged)
        def _():
            # Ragged tail block and/or clamped overhang step: zero rows past
            # the true flattened extent before accumulating.
            rows = lax.broadcasted_iota(jnp.int32, (1, tr, 1), 1) + blk * tr
            valid = rows < r_total
            _accumulate(jnp.where(valid, x, 0.0), jnp.where(valid, t, 0.0))


def dice_loss_weighted(x, target, *, eps=EPS,
                       target_block_bytes=8 * _MIB,
                       tr=None, force_n_par=None):
    """Pallas equivalent of dice_loss_weighted.forward. Returns a scalar."""
    assert x.shape == target.shape
    b = x.shape[0]
    n = math.prod(x.shape[1:])

    vmem_cap, n_cores = _tpu_hw()
    # Scoped-VMEM budget: ~3/4 of physical VMEM (48 MiB on v7x's 64 MiB,
    # 96 MiB on v5e/v6e's 128 MiB), never below 32 MiB.
    vmem_budget = max(32 * _MIB, (vmem_cap * 3) // 4)

    # Flatten non-batch dims. Contiguous reshape is free; no astype here so
    # bf16/f16 inputs stream at their native (smaller) HBM footprint.
    x2 = x.reshape(b, n)
    t2 = target.reshape(b, n)

    r = pl.cdiv(n, _LANE)
    n_pad = r * _LANE
    if n_pad != n:
        # Rare fallback (typical C*D*H*W products are multiples of 128);
        # zeros contribute 0 to both sums so semantics are exact.
        x2 = jnp.pad(x2, ((0, 0), (0, n_pad - n)))
        t2 = jnp.pad(t2, ((0, 0), (0, n_pad - n)))

    # (B, R, 128): lane/sublane dense view of the flattened volume.
    x3 = x2.reshape(b, r, _LANE)
    t3 = t2.reshape(b, r, _LANE)

    n_f32_temps = 2 if (x.dtype == jnp.float32 and target.dtype == jnp.float32) else 4
    tr_sel, kb, n_par = _choose_tiling(
        r, b, x.dtype.itemsize, target.dtype.itemsize, n_f32_temps,
        target_block_bytes, vmem_budget, n_cores,
        forced_tr=tr, force_n_par=force_n_par)
    tr = tr_sel
    kpp = pl.cdiv(kb, n_par)                      # row-blocks per parallel slice
    mask_needed = (r % tr != 0) or (n_par * kpp != kb)
    sublane_acc = (tr % 8 == 0)

    if n_par * kpp == kb:
        def in_map(pi, ki):
            return (0, pi * kpp + ki, 0)
    else:
        def in_map(pi, ki):
            # Clamp overhang steps to a valid block (their contribution is
            # zeroed in-kernel) rather than issuing an out-of-bounds DMA.
            return (0, jnp.minimum(pi * kpp + ki, kb - 1), 0)

    in_spec = pl.BlockSpec((b, tr, _LANE), in_map)

    if sublane_acc:
        acc_shape = (n_par, b, 8, _LANE)
        out_spec = pl.BlockSpec((pl.Squeezed(), b, 8, _LANE),
                                lambda pi, ki: (pi, 0, 0, 0))
    else:
        acc_shape = (n_par, b, _LANE)
        out_spec = pl.BlockSpec((pl.Squeezed(), b, _LANE),
                                lambda pi, ki: (pi, 0, 0))

    # vmem limit: actual footprint (+ slack), chip-clamped.
    in_buf_bytes = 2 * b * tr * _LANE * (x.dtype.itemsize + target.dtype.itemsize)
    tmp_bytes = n_f32_temps * b * tr * _LANE * 4
    acc_bytes = 2 * 2 * math.prod(acc_shape[1:]) * 4
    vmem_limit = int(min(vmem_budget,
                         max(32 * _MIB,
                             in_buf_bytes + tmp_bytes + acc_bytes + 4 * _MIB)))

    inter_p, card_p = pl.pallas_call(
        partial(_dice_partial_kernel, tr=tr, kpp=kpp, r_total=r,
                sublane_acc=sublane_acc, mask_needed=mask_needed),
        out_shape=(jax.ShapeDtypeStruct(acc_shape, jnp.float32),
                   jax.ShapeDtypeStruct(acc_shape, jnp.float32)),
        grid_spec=pltpu.PrefetchScalarGridSpec(
            num_scalar_prefetch=0,
            grid=(n_par, kpp),
            in_specs=[in_spec, in_spec],
            out_specs=[out_spec, out_spec],
        ),
        compiler_params=pltpu.CompilerParams(
            dimension_semantics=("parallel", "arbitrary"),
            vmem_limit_bytes=vmem_limit,
        ),
    )(x3, t3)

    # Tiny epilogue on the per-lane/per-sublane partials in plain JAX.
    inter = jnp.sum(inter_p.reshape(n_par, b, -1), axis=(0, 2))   # (B,)
    card = jnp.sum(card_p.reshape(n_par, b, -1), axis=(0, 2))     # (B,)
    dice = 1.0 - 2.0 * inter / (card + eps)                       # (B,)
    # max_val * (dice / max_val) == dice algebraically; keep the original
    # formulation for exact semantic parity with the PyTorch module
    # (including the NaN when max(dice) == 0).
    max_val = jnp.max(dice)
    weights = dice / max_val
    return jnp.mean(max_val * weights)


def _dice_loss_weighted_ref(x, target, eps=EPS):
    dims = tuple(range(1, x.ndim))
    inter = jnp.sum(x * target, axis=dims)
    card = jnp.sum(x + target, axis=dims)
    dice = 1.0 - 2.0 * inter / (card + eps)
    max_val = jnp.max(dice)
    weights = dice / max_val
    return jnp.mean(max_val * weights)


if __name__ == "__main__":
    key = jax.random.PRNGKey(0)
    kx, kt = jax.random.split(key)

    # (shape, kwargs) — covers: single-block vreg-aligned path, mask-free
    # 2-way parallel split, ragged tail + overhang clamp/mask path, lane-pad
    # fallback, and the default auto-tiled multi-block path.
    cases = [
        ((2, 4, 4, 8, 16), dict()),                                # R=16: one block
        ((2, 4, 4, 8, 16), dict(tr=8, force_n_par=2)),             # clean 2-way split
        ((2, 4, 5, 4, 32), dict(tr=8, force_n_par=2)),             # ragged + overhang
        ((2, 3, 3, 5, 7), dict()),                                 # lane-pad fallback
        ((2, 8, 16, 16, 32), dict(target_block_bytes=256 * 1024)), # auto multi-block
    ]

    for i, (shape, kwargs) in enumerate(cases):
        kxi = jax.random.fold_in(kx, i)
        kti = jax.random.fold_in(kt, i)
        x = jax.random.uniform(kxi, shape, dtype=jnp.float32)
        target = (jax.random.uniform(kti, shape, dtype=jnp.float32) > 0.5).astype(
            jnp.float32
        )

        out = jax.block_until_ready(dice_loss_weighted(x, target, **kwargs))
        ref = _dice_loss_weighted_ref(x, target)
        assert jnp.allclose(out, ref, rtol=1e-5, atol=1e-6), (shape, kwargs, out, ref)

    print("KERNEL_OK")
</pallas_src>

<mosaic_0001>
module attributes {stable_mosaic.version = 11 : i64} {
  func.func @_dice_partial_kernel(%arg0: i32, %arg1: i32, %arg2: memref<2x16x128xf32, #tpu.memory_space<vmem>>, %arg3: memref<2x16x128xf32, #tpu.memory_space<vmem>>, %arg4: memref<1x2x8x128xf32, #tpu.memory_space<vmem>>, %arg5: memref<1x2x8x128xf32, #tpu.memory_space<vmem>>) attributes {dimension_semantics = [#tpu.dimension_semantics<parallel>, #tpu.dimension_semantics<arbitrary>], iteration_bounds = array<i64: 1, 1>, scalar_prefetch = 0 : i64, scratch_operands = 0 : i64, tpu.core_type = #tpu.core_type<tc>, window_params = [{transform_indices = @transform_0, window_bounds = array<i64: 2, 16, 128>}, {transform_indices = @transform_1, window_bounds = array<i64: 2, 16, 128>}, {transform_indices = @transform_2, window_bounds = array<i64: 1, 2, 8, 128>}, {transform_indices = @transform_3, window_bounds = array<i64: 1, 2, 8, 128>}]} {
    %c0_i32 = arith.constant 0 : i32
    %0 = arith.cmpi eq, %arg1, %c0_i32 : i32
    %1 = arith.extui %0 : i1 to i32
    %c0_i32_0 = arith.constant 0 : i32
    %2 = arith.cmpi ne, %1, %c0_i32_0 : i32
    scf.if %2 {
      %cst_23 = arith.constant 0.000000e+00 : f32
      %23 = vector.broadcast %cst_23 : f32 to vector<2x8x128xf32>
      %c0_24 = arith.constant 0 : index
      %c0_25 = arith.constant 0 : index
      %c0_26 = arith.constant 0 : index
      %c0_27 = arith.constant 0 : index
      %24 = vector.load %arg4[%c0_24, %c0_25, %c0_26, %c0_27] : memref<1x2x8x128xf32, #tpu.memory_space<vmem>>, vector<1x2x8x128xf32>
      %25 = vector.shape_cast %24 : vector<1x2x8x128xf32> to vector<2x8x128xf32>
      %26 = vector.shape_cast %23 : vector<2x8x128xf32> to vector<1x2x8x128xf32>
      tpu.vector_store %arg4[%c0_24, %c0_25, %c0_26, %c0_27], %26 {strides = array<i32>} : memref<1x2x8x128xf32, #tpu.memory_space<vmem>>, vector<1x2x8x128xf32>,
      %cst_28 = arith.constant 0.000000e+00 : f32
      %27 = vector.broadcast %cst_28 : f32 to vector<2x8x128xf32>
      %c0_29 = arith.constant 0 : index
      %c0_30 = arith.constant 0 : index
      %c0_31 = arith.constant 0 : index
      %c0_32 = arith.constant 0 : index
      %28 = vector.load %arg5[%c0_29, %c0_30, %c0_31, %c0_32] : memref<1x2x8x128xf32, #tpu.memory_space<vmem>>, vector<1x2x8x128xf32>
      %29 = vector.shape_cast %28 : vector<1x2x8x128xf32> to vector<2x8x128xf32>
      %30 = vector.shape_cast %27 : vector<2x8x128xf32> to vector<1x2x8x128xf32>
      tpu.vector_store %arg5[%c0_29, %c0_30, %c0_31, %c0_32], %30 {strides = array<i32>} : memref<1x2x8x128xf32, #tpu.memory_space<vmem>>, vector<1x2x8x128xf32>,
    } else {
    }
    %c0 = arith.constant 0 : index
    %c0_1 = arith.constant 0 : index
    %c0_2 = arith.constant 0 : index
    %3 = vector.load %arg2[%c0, %c0_1, %c0_2] : memref<2x16x128xf32, #tpu.memory_space<vmem>>, vector<2x16x128xf32>
    %c0_3 = arith.constant 0 : index
    %c0_4 = arith.constant 0 : index
    %c0_5 = arith.constant 0 : index
    %4 = vector.load %arg3[%c0_3, %c0_4, %c0_5] : memref<2x16x128xf32, #tpu.memory_space<vmem>>, vector<2x16x128xf32>
    %5 = arith.mulf %3, %4 : vector<2x16x128xf32>
    %6 = arith.addf %3, %4 : vector<2x16x128xf32>
    %7 = vector.shape_cast %5 : vector<2x16x128xf32> to vector<2x2x8x128xf32>
    %8 = vector.shape_cast %6 : vector<2x16x128xf32> to vector<2x2x8x128xf32>
    %c0_6 = arith.constant 0 : index
    %c0_7 = arith.constant 0 : index
    %c0_8 = arith.constant 0 : index
    %c0_9 = arith.constant 0 : index
    %9 = vector.load %arg4[%c0_6, %c0_7, %c0_8, %c0_9] : memref<1x2x8x128xf32, #tpu.memory_space<vmem>>, vector<1x2x8x128xf32>
    %10 = vector.shape_cast %9 : vector<1x2x8x128xf32> to vector<2x8x128xf32>
    %cst = arith.constant dense<0.000000e+00> : vector<2x8x128xf32>
    %11 = vector.multi_reduction <add>, %7, %cst [1] : vector<2x2x8x128xf32> to vector<2x8x128xf32>
    %12 = arith.addf %10, %11 : vector<2x8x128xf32>
    %c0_10 = arith.constant 0 : index
    %c0_11 = arith.constant 0 : index
    %c0_12 = arith.constant 0 : index
    %c0_13 = arith.constant 0 : index
    %13 = vector.load %arg4[%c0_10, %c0_11, %c0_12, %c0_13] : memref<1x2x8x128xf32, #tpu.memory_space<vmem>>, vector<1x2x8x128xf32>
    %14 = vector.shape_cast %13 : vector<1x2x8x128xf32> to vector<2x8x128xf32>
    %15 = vector.shape_cast %12 : vector<2x8x128xf32> to vector<1x2x8x128xf32>
    tpu.vector_store %arg4[%c0_10, %c0_11, %c0_12, %c0_13], %15 {strides = array<i32>} : memref<1x2x8x128xf32, #tpu.memory_space<vmem>>, vector<1x2x8x128xf32>,
    %c0_14 = arith.constant 0 : index
    %c0_15 = arith.constant 0 : index
    %c0_16 = arith.constant 0 : index
    %c0_17 = arith.constant 0 : index
    %16 = vector.load %arg5[%c0_14, %c0_15, %c0_16, %c0_17] : memref<1x2x8x128xf32, #tpu.memory_space<vmem>>, vector<1x2x8x128xf32>
    %17 = vector.shape_cast %16 : vector<1x2x8x128xf32> to vector<2x8x128xf32>
    %cst_18 = arith.constant dense<0.000000e+00> : vector<2x8x128xf32>
    %18 = vector.multi_reduction <add>, %8, %cst_18 [1] : vector<2x2x8x128xf32> to vector<2x8x128xf32>
    %19 = arith.addf %17, %18 : vector<2x8x128xf32>
    %c0_19 = arith.constant 0 : index
    %c0_20 = arith.constant 0 : index
    %c0_21 = arith.constant 0 : index
    %c0_22 = arith.constant 0 : index
    %20 = vector.load %arg5[%c0_19, %c0_20, %c0_21, %c0_22] : memref<1x2x8x128xf32, #tpu.memory_space<vmem>>, vector<1x2x8x128xf32>
    %21 = vector.shape_cast %20 : vector<1x2x8x128xf32> to vector<2x8x128xf32>
    %22 = vector.shape_cast %19 : vector<2x8x128xf32> to vector<1x2x8x128xf32>
    tpu.vector_store %arg5[%c0_19, %c0_20, %c0_21, %c0_22], %22 {strides = array<i32>} : memref<1x2x8x128xf32, #tpu.memory_space<vmem>>, vector<1x2x8x128xf32>,
    return
  }
  func.func @transform_0(%arg0: i32, %arg1: i32) -> (i32, i32, i32) {
    %c1_i32 = arith.constant 1 : i32
    %0 = arith.muli %arg0, %c1_i32 : i32
    %1 = arith.addi %0, %arg1 : i32
    %c0_i32 = arith.constant 0 : i32
    %c0_i32_0 = arith.constant 0 : i32
    %c0_i32_1 = arith.constant 0 : i32
    return %c0_i32, %1, %c0_i32_0 : i32, i32, i32
  }
  func.func @transform_1(%arg0: i32, %arg1: i32) -> (i32, i32, i32) {
    %c1_i32 = arith.constant 1 : i32
    %0 = arith.muli %arg0, %c1_i32 : i32
    %1 = arith.addi %0, %arg1 : i32
    %c0_i32 = arith.constant 0 : i32
    %c0_i32_0 = arith.constant 0 : i32
    %c0_i32_1 = arith.constant 0 : i32
    return %c0_i32, %1, %c0_i32_0 : i32, i32, i32
  }
  func.func @transform_2(%arg0: i32, %arg1: i32) -> (i32, i32, i32, i32) {
    %c0_i32 = arith.constant 0 : i32
    %c0_i32_0 = arith.constant 0 : i32
    %c0_i32_1 = arith.constant 0 : i32
    %c0_i32_2 = arith.constant 0 : i32
    return %arg0, %c0_i32, %c0_i32_0, %c0_i32_1 : i32, i32, i32, i32
  }
  func.func @transform_3(%arg0: i32, %arg1: i32) -> (i32, i32, i32, i32) {
    %c0_i32 = arith.constant 0 : i32
    %c0_i32_0 = arith.constant 0 : i32
    %c0_i32_1 = arith.constant 0 : i32
    %c0_i32_2 = arith.constant 0 : i32
    return %arg0, %c0_i32, %c0_i32_0, %c0_i32_1 : i32, i32, i32, i32
  }
}

</mosaic_0001>

<bundles_post_ra>
// kernel: tpu_custom_call.1
= control target key start
LH: loop header
LB: loop body
LE: loop exit
PB: predicated region body
PF: predicated region fallthrough
CT: control target
= control target key end

     0   :  { %9 = vsyncpa [#allocation3], 0  ;;  %s274_s0 = inlined_call_operand.hbm [shape: f32[2,16,128], index: 0, kind: input, shape index: {}]   ;;  %s275_s1 = inlined_call_operand.hbm [shape: f32[2,16,128], index: 1, kind: input, shape index: {}]   ;;  %s276_s2 = inlined_call_operand.hbm [shape: f32[1,2,8,128], index: 2, kind: output, shape index: {0}]   ;;  %s277_s3 = inlined_call_operand.hbm [shape: f32[1,2,8,128], index: 3, kind: output, shape index: {1}]  }
   0x1   :  { %10 = vsyncpa [#allocation6], 0 }
   0x2   :  { %11 = vsyncpa [#allocation4], 0 }
   0x3   :  { %12 = vsyncpa [#allocation9], 0  ;;  %s224_s12 = smov [#allocation2]  }
   0x4   :  { %s22_s13 = sshll.u32 %s224_s12, 4  ;;  %s23_s13 = int_to_ptr.vmem [resolvable:$true] %s22_s13 }
   0x5   :  { %s144_s14 = scalar_lea.vmem %s23_s13, 512  ;;  %p149_p1 = scmp.lt.s32.totalorder %s23_s13, %s23_s13 }
   0x6   :  { %p145_p0 = scmp.ne.s32.totalorder %s23_s13, %s144_s14  ;;  %p150_p2 = scmp.lt.s32.totalorder %s144_s14, %s144_s14 }
   0x8   :  { %p151_p3 = por %p150_p2, %p149_p1 }
   0xa   :  { %p152_p4 = pnand %p151_p3, %p145_p0 }
   0xc   :  { %155 = shalt.err (!%p152_p4)
}
   0xd   :  { %s225_s15 = smov 128   ;;  %s226_s16 = smov 8  }
   0xe   :  { %28 = dma.hbm_to_vmem [thread:$0]  %s274_s0, 512, %s23_s13, [#allocation3], %s225_s15, %s225_s15, %s226_s16  }
   0xf   :  { %s227_s19 = smov [#allocation5]  }
  0x10   :  { %s38_s20 = sshll.u32 %s227_s19, 4  ;;  %s39_s20 = int_to_ptr.vmem [resolvable:$true] %s38_s20 }
  0x11   :  { %s164_s21 = scalar_lea.vmem %s39_s20, 512  ;;  %p169_p6 = scmp.lt.s32.totalorder %s39_s20, %s39_s20 }
  0x12   :  { %p165_p5 = scmp.ne.s32.totalorder %s39_s20, %s164_s21  ;;  %p170_p7 = scmp.lt.s32.totalorder %s164_s21, %s164_s21 }
  0x14   :  { %p171_p8 = por %p170_p7, %p169_p6 }
  0x16   :  { %p172_p9 = pnand %p171_p8, %p165_p5 }
  0x18   :  { %175 = shalt.err (!%p172_p9)
}
  0x19   :  { %44 = dma.hbm_to_vmem [thread:$0]  %s275_s1, 512, %s39_s20, [#allocation6], %s225_s15, %s225_s15, %s226_s16  }
  0x1a   :  { %216 = dma.done.wait [#allocation3], 512  }
  0x1b   :  { %217 = vsyncadd [#allocation3], 4294966784 }
  0x1c   :  { %218 = dma.done.wait [#allocation6], 512  }
  0x1d   :  { %219 = vsyncadd [#allocation6], 4294966784  ;;  %v63_v0 = vld [vmem:[#allocation2] sm:$0xff]  ;;  %v64_v1 = vld [vmem:[#allocation2 + $0x8] sm:$0xff]  ;;  %s228_s0 = smov [#allocation7]   ;;  %s229_s24 = smov [#allocation8]  }
  0x1e   :  { %v67_v2 = vld [vmem:[#allocation5] sm:$0xff]  ;;  %v68_v3 = vld [vmem:[#allocation5 + $0x8] sm:$0xff]  ;;  %v65_v5 = vld [vmem:[#allocation2 + $0x10] sm:$0xff]  ;;  %s100_s1 = sshll.u32 %s228_s0, 4  ;;  %s112_s25 = sshll.u32 %s229_s24, 4  ;;  %s101_s1 = int_to_ptr.vmem [resolvable:$true] %s100_s1  ;;  %s113_s25 = int_to_ptr.vmem [resolvable:$true] %s112_s25 }
  0x1f   :  { %v71_v4 = vmul.f32 %v67_v2, %v63_v0  ;;  %v66_v6 = vld [vmem:[#allocation2 + $0x18] sm:$0xff]  ;;  %v75_v7 = vadd.f32 %v67_v2, %v63_v0  ;;  %v72_v8 = vmul.f32 %v68_v3, %v64_v1  ;;  %v69_v9 = vld [vmem:[#allocation5 + $0x10] sm:$0xff]  ;;  %v76_v11 = vadd.f32 %v68_v3, %v64_v1  ;;  %s176_s26 = scalar_lea.vmem %s101_s1, 256  ;;  %p181_p11 = scmp.lt.s32.totalorder %s101_s1, %s101_s1 }
  0x20   :  { %v70_v10 = vld [vmem:[#allocation5 + $0x18] sm:$0xff]  ;;  %v73_v12 = vmul.f32 %v69_v9, %v65_v5  ;;  %v77_v14 = vadd.f32 %v69_v9, %v65_v5  ;;  %p177_p10 = scmp.ne.s32.totalorder %s101_s1, %s176_s26  ;;  %p182_p12 = scmp.lt.s32.totalorder %s176_s26, %s176_s26 }
  0x21   :  { %v74_v13 = vmul.f32 %v70_v10, %v66_v6  ;;  %v78_v15 = vadd.f32 %v70_v10, %v66_v6  ;;  %v81_v16 = vadd.f32 %v72_v8, %v71_v4  ;;  %v89_v17 = vadd.f32 %v76_v11, %v75_v7 }
  0x22   :  { %p183_p13 = por %p182_p12, %p181_p11 }
  0x23   :  { %v82_v18 = vadd.f32 %v74_v13, %v73_v12  ;;  %v90_v19 = vadd.f32 %v78_v15, %v77_v14  ;;  %85 = vst [vmem:[#allocation7] sm:$0xff] %v81_v16  ;;  %93 = vst [vmem:[#allocation8] sm:$0xff] %v89_v17 }
  0x24   :  { %p184_p0 = pnand %p183_p13, %p177_p10 }
  0x25   :  { %86 = vst [vmem:[#allocation7 + $0x8] sm:$0xff] %v82_v18  ;;  %94 = vst [vmem:[#allocation8 + $0x8] sm:$0xff] %v90_v19 }
  0x26   :  { %187 = shalt.err (!%p184_p0)
}
  0x27   :  { %106 = dma.vmem_to_hbm [thread:$0]  %s101_s1, 256, %s276_s2, [#allocation4], %s225_s15, %s225_s15, %s226_s16  }
  0x28   :  { %s196_s29 = scalar_lea.vmem %s113_s25, 256  ;;  %p201_p2 = scmp.lt.s32.totalorder %s113_s25, %s113_s25 }
  0x29   :  { %p197_p1 = scmp.ne.s32.totalorder %s113_s25, %s196_s29  ;;  %p202_p3 = scmp.lt.s32.totalorder %s196_s29, %s196_s29 }
  0x2b   :  { %p203_p4 = por %p202_p3, %p201_p2 }
  0x2d   :  { %p204_p5 = pnand %p203_p4, %p197_p1 }
  0x2f   :  { %207 = shalt.err (!%p204_p5)
}
  0x30   :  { %118 = dma.vmem_to_hbm [thread:$0]  %s113_s25, 256, %s277_s3, [#allocation9], %s225_s15, %s225_s15, %s226_s16  }
  0x31   :  { %220 = dma.done.wait [#allocation4], 256  }
  0x32   :  { %221 = vsyncadd [#allocation4], 4294967040 }
  0x33   :  { %222 = dma.done.wait [#allocation9], 256  }
  0x34   :  { %223 = vsyncadd [#allocation9], 4294967040 }
  0x35   :  { %125 = vsyncpa [#allocation3], 1 }
  0x36   :  { %126 = vsyncpa [#allocation6], 1 }
  0x37   :  { %127 = vsyncpa [#allocation4], 1 }
  0x38   :  { %128 = vsyncpa [#allocation9], 1 }

</bundles_post_ra>
